<compile_context>
chip_gen: v5e
topology: v5e:2x2
jax: 0.10.0
libtpu: 0.0.40
codegen_flags: <defaults>
</compile_context>

<pallas_src>
import jax
import jax.numpy as jnp
from jax.experimental import pallas as pl
from jax.experimental.pallas import tpu as pltpu


def mlp_kernel(x_ref, w1_ref, b1_ref, w2_ref, b2_ref,
               w3_ref, b3_ref, w4t_ref, b4_ref, o_ref):
    x = x_ref[...]                                     # (2, TB)  float32
    w1 = w1_ref[...]                                   # (32, 2)

    # Layer 1: contraction dim is only 2 -> outer-product broadcasts on the VPU
    # instead of a 2/256-utilized MXU matmul.  Bias is (32, 1): lane-direction broadcast.
    h = w1[:, 0:1] * x[0:1, :] + w1[:, 1:2] * x[1:2, :] + b1_ref[...]   # (32, TB)
    h = jnp.maximum(h, 0.0)

    # Layers 2 and 3: 32x32 matmuls on the MXU, bf16 operands / f32 accumulation.
    h = jnp.dot(w2_ref[...].astype(jnp.bfloat16), h.astype(jnp.bfloat16),
                preferred_element_type=jnp.float32) + b2_ref[...]
    h = jnp.maximum(h, 0.0)
    h = jnp.dot(w3_ref[...].astype(jnp.bfloat16), h.astype(jnp.bfloat16),
                preferred_element_type=jnp.float32) + b3_ref[...]
    h = jnp.maximum(h, 0.0)

    # Layer 4: out_features == 1 -> elementwise multiply + sublane reduction
    # (avoids an M=1 matmul); produces a lane-dense (1, TB) logit tile.
    logit = jnp.sum(h * w4t_ref[...], axis=0, keepdims=True) + b4_ref[...]   # (1, TB)

    # Sigmoid: exp on the EUP, approximate reciprocal rides the free EUP slot.
    o_ref[...] = pl.reciprocal(1.0 + jnp.exp(-logit), approx=True)


def neural_classificator(x, params, *, tb=4096):
    """x: (B, 2) float32. params: PyTorch-layout weights/biases. Returns (B, 1)."""
    B = x.shape[0]
    # Lane tile must be a multiple of 128; don't over-pad small batches.
    tb = min(tb, pl.cdiv(B, 128) * 128)
    b_pad = pl.cdiv(B, tb) * tb
    n_tiles = b_pad // tb

    # Feature-major input (2, B_pad); ragged tail is zero-padded and sliced off afterwards.
    xt = jnp.zeros((2, b_pad), jnp.float32).at[:, :B].set(x.T.astype(jnp.float32))

    # Weights stay in PyTorch (out, in) layout -> feature-major matmul is W @ h directly.
    w1, b1 = params["w1"], params["b1"].reshape(32, 1)
    w2, b2 = params["w2"], params["b2"].reshape(32, 1)
    w3, b3 = params["w3"], params["b3"].reshape(32, 1)
    w4t = params["w4"].T                               # (32, 1)
    b4 = params["b4"].reshape(1, 1)

    def const_spec(shape):
        # Constant index_map -> fetched once, resident in VMEM across the whole grid.
        return pl.BlockSpec(shape, lambda i: (0, 0))

    out_pad = pl.pallas_call(
        mlp_kernel,
        out_shape=jax.ShapeDtypeStruct((1, b_pad), jnp.float32),
        grid=(n_tiles,),
        in_specs=[
            pl.BlockSpec((2, tb), lambda i: (0, i)),   # x tile (streamed, double-buffered)
            const_spec((32, 2)),  const_spec((32, 1)),   # w1, b1
            const_spec((32, 32)), const_spec((32, 1)),   # w2, b2
            const_spec((32, 32)), const_spec((32, 1)),   # w3, b3
            const_spec((32, 1)),  const_spec((1, 1)),    # w4^T, b4
        ],
        out_specs=pl.BlockSpec((1, tb), lambda i: (0, i)),
        compiler_params=pltpu.CompilerParams(
            dimension_semantics=("parallel",)),        # shard batch tiles over v7x's 2 TCs
    )(xt, w1, b1, w2, b2, w3, b3, w4t, b4)

    return out_pad[0, :B].reshape(B, 1)


def init_params(key):
    """Deterministic init mimicking PyTorch's U(-1/sqrt(fan_in), +1/sqrt(fan_in)).

    Weights are stored in PyTorch layout: (out_features, in_features); biases (out_features,).
    """
    def linear(key, fan_in, fan_out):
        kw, kb = jax.random.split(key)
        bound = 1.0 / jnp.sqrt(float(fan_in))
        w = jax.random.uniform(kw, (fan_out, fan_in), jnp.float32, -bound, bound)
        b = jax.random.uniform(kb, (fan_out,), jnp.float32, -bound, bound)
        return w, b

    k1, k2, k3, k4 = jax.random.split(key, 4)
    w1, b1 = linear(k1, 2, 32)
    w2, b2 = linear(k2, 32, 32)
    w3, b3 = linear(k3, 32, 32)
    w4, b4 = linear(k4, 32, 1)
    return dict(w1=w1, b1=b1, w2=w2, b2=b2, w3=w3, b3=b3, w4=w4, b4=b4)


def reference(x, p):
    """Pure-JAX f32 reference (PyTorch semantics: y = x @ W.T + b)."""
    h = jnp.maximum(x @ p["w1"].T + p["b1"], 0.0)
    h = jnp.maximum(h @ p["w2"].T + p["b2"], 0.0)
    h = jnp.maximum(h @ p["w3"].T + p["b3"], 0.0)
    return jax.nn.sigmoid(h @ p["w4"].T + p["b4"])


if __name__ == "__main__":
    key = jax.random.PRNGKey(0)
    kx, kp = jax.random.split(key)

    B = 8
    x = jax.random.normal(kx, (B, 2), dtype=jnp.float32)
    params = init_params(kp)

    out = neural_classificator(x, params)
    out = jax.block_until_ready(out)

    ref = reference(x, params)
    assert out.shape == (B, 1)
    # bf16 matmul operands + approx reciprocal => compare with a modest tolerance.
    assert jnp.allclose(out, ref, atol=1e-2, rtol=1e-2), jnp.max(jnp.abs(out - ref))

    print("KERNEL_OK")
</pallas_src>

<mosaic_0001>
module attributes {stable_mosaic.version = 11 : i64} {
  func.func @mlp_kernel(%arg0: i32, %arg1: memref<2x128xf32, #tpu.memory_space<vmem>>, %arg2: memref<32x2xf32, #tpu.memory_space<vmem>>, %arg3: memref<32x1xf32, #tpu.memory_space<vmem>>, %arg4: memref<32x32xf32, #tpu.memory_space<vmem>>, %arg5: memref<32x1xf32, #tpu.memory_space<vmem>>, %arg6: memref<32x32xf32, #tpu.memory_space<vmem>>, %arg7: memref<32x1xf32, #tpu.memory_space<vmem>>, %arg8: memref<32x1xf32, #tpu.memory_space<vmem>>, %arg9: memref<1x1xf32, #tpu.memory_space<vmem>>, %arg10: memref<1x128xf32, #tpu.memory_space<vmem>>) attributes {dimension_semantics = [#tpu.dimension_semantics<parallel>], iteration_bounds = array<i64: 1>, scalar_prefetch = 0 : i64, scratch_operands = 0 : i64, tpu.core_type = #tpu.core_type<tc>, window_params = [{transform_indices = @transform_0, window_bounds = array<i64: 2, 128>}, {pipeline_mode = #tpu.pipeline_mode<synchronous>, transform_indices = @transform_1, window_bounds = array<i64: 32, 2>}, {pipeline_mode = #tpu.pipeline_mode<synchronous>, transform_indices = @transform_2, window_bounds = array<i64: 32, 1>}, {pipeline_mode = #tpu.pipeline_mode<synchronous>, transform_indices = @transform_3, window_bounds = array<i64: 32, 32>}, {pipeline_mode = #tpu.pipeline_mode<synchronous>, transform_indices = @transform_4, window_bounds = array<i64: 32, 1>}, {pipeline_mode = #tpu.pipeline_mode<synchronous>, transform_indices = @transform_5, window_bounds = array<i64: 32, 32>}, {pipeline_mode = #tpu.pipeline_mode<synchronous>, transform_indices = @transform_6, window_bounds = array<i64: 32, 1>}, {pipeline_mode = #tpu.pipeline_mode<synchronous>, transform_indices = @transform_7, window_bounds = array<i64: 32, 1>}, {pipeline_mode = #tpu.pipeline_mode<synchronous>, transform_indices = @transform_8, window_bounds = array<i64: 1, 1>}, {transform_indices = @transform_9, window_bounds = array<i64: 1, 128>}]} {
    %c0 = arith.constant 0 : index
    %c0_0 = arith.constant 0 : index
    %0 = vector.load %arg1[%c0, %c0_0] : memref<2x128xf32, #tpu.memory_space<vmem>>, vector<2x128xf32>
    %c0_1 = arith.constant 0 : index
    %c0_2 = arith.constant 0 : index
    %1 = vector.load %arg2[%c0_1, %c0_2] : memref<32x2xf32, #tpu.memory_space<vmem>>, vector<32x2xf32>
    %2 = vector.extract_strided_slice %1 {offsets = [0, 0], sizes = [32, 1], strides = [1, 1]} : vector<32x2xf32> to vector<32x1xf32>
    %3 = vector.extract_strided_slice %0 {offsets = [0, 0], sizes = [1, 128], strides = [1, 1]} : vector<2x128xf32> to vector<1x128xf32>
    %4 = vector.broadcast %2 : vector<32x1xf32> to vector<32x128xf32>
    %5 = vector.broadcast %3 : vector<1x128xf32> to vector<32x128xf32>
    %6 = arith.mulf %4, %5 : vector<32x128xf32>
    %7 = vector.extract_strided_slice %1 {offsets = [0, 1], sizes = [32, 1], strides = [1, 1]} : vector<32x2xf32> to vector<32x1xf32>
    %8 = vector.extract_strided_slice %0 {offsets = [1, 0], sizes = [1, 128], strides = [1, 1]} : vector<2x128xf32> to vector<1x128xf32>
    %9 = vector.broadcast %7 : vector<32x1xf32> to vector<32x128xf32>
    %10 = vector.broadcast %8 : vector<1x128xf32> to vector<32x128xf32>
    %11 = arith.mulf %9, %10 : vector<32x128xf32>
    %12 = arith.addf %6, %11 : vector<32x128xf32>
    %c0_3 = arith.constant 0 : index
    %c0_4 = arith.constant 0 : index
    %13 = vector.load %arg3[%c0_3, %c0_4] : memref<32x1xf32, #tpu.memory_space<vmem>>, vector<32x1xf32>
    %14 = vector.broadcast %13 : vector<32x1xf32> to vector<32x128xf32>
    %15 = arith.addf %12, %14 : vector<32x128xf32>
    %cst = arith.constant 0.000000e+00 : f32
    %16 = vector.broadcast %cst : f32 to vector<32x128xf32>
    %17 = arith.maximumf %15, %16 : vector<32x128xf32>
    %c0_5 = arith.constant 0 : index
    %c0_6 = arith.constant 0 : index
    %18 = vector.load %arg4[%c0_5, %c0_6] : memref<32x32xf32, #tpu.memory_space<vmem>>, vector<32x32xf32>
    %19 = arith.truncf %18 : vector<32x32xf32> to vector<32x32xbf16>
    %20 = arith.truncf %17 : vector<32x128xf32> to vector<32x128xbf16>
    %cst_7 = arith.constant dense<0.000000e+00> : vector<32x128xf32>
    %21 = tpu.matmul %19, %20, %cst_7 {dimension_numbers = #tpu.dot_dimension_numbers<[1], [0], [0], [1], [0, 0, 1, 1], [], []>} : vector<32x32xbf16>, vector<32x128xbf16>, vector<32x128xf32> -> vector<32x128xf32>
    %c0_8 = arith.constant 0 : index
    %c0_9 = arith.constant 0 : index
    %22 = vector.load %arg5[%c0_8, %c0_9] : memref<32x1xf32, #tpu.memory_space<vmem>>, vector<32x1xf32>
    %23 = vector.broadcast %22 : vector<32x1xf32> to vector<32x128xf32>
    %24 = arith.addf %21, %23 : vector<32x128xf32>
    %cst_10 = arith.constant 0.000000e+00 : f32
    %25 = vector.broadcast %cst_10 : f32 to vector<32x128xf32>
    %26 = arith.maximumf %24, %25 : vector<32x128xf32>
    %c0_11 = arith.constant 0 : index
    %c0_12 = arith.constant 0 : index
    %27 = vector.load %arg6[%c0_11, %c0_12] : memref<32x32xf32, #tpu.memory_space<vmem>>, vector<32x32xf32>
    %28 = arith.truncf %27 : vector<32x32xf32> to vector<32x32xbf16>
    %29 = arith.truncf %26 : vector<32x128xf32> to vector<32x128xbf16>
    %cst_13 = arith.constant dense<0.000000e+00> : vector<32x128xf32>
    %30 = tpu.matmul %28, %29, %cst_13 {dimension_numbers = #tpu.dot_dimension_numbers<[1], [0], [0], [1], [0, 0, 1, 1], [], []>} : vector<32x32xbf16>, vector<32x128xbf16>, vector<32x128xf32> -> vector<32x128xf32>
    %c0_14 = arith.constant 0 : index
    %c0_15 = arith.constant 0 : index
    %31 = vector.load %arg7[%c0_14, %c0_15] : memref<32x1xf32, #tpu.memory_space<vmem>>, vector<32x1xf32>
    %32 = vector.broadcast %31 : vector<32x1xf32> to vector<32x128xf32>
    %33 = arith.addf %30, %32 : vector<32x128xf32>
    %cst_16 = arith.constant 0.000000e+00 : f32
    %34 = vector.broadcast %cst_16 : f32 to vector<32x128xf32>
    %35 = arith.maximumf %33, %34 : vector<32x128xf32>
    %c0_17 = arith.constant 0 : index
    %c0_18 = arith.constant 0 : index
    %36 = vector.load %arg8[%c0_17, %c0_18] : memref<32x1xf32, #tpu.memory_space<vmem>>, vector<32x1xf32>
    %37 = vector.broadcast %36 : vector<32x1xf32> to vector<32x128xf32>
    %38 = arith.mulf %35, %37 : vector<32x128xf32>
    %cst_19 = arith.constant dense<0.000000e+00> : vector<128xf32>
    %39 = vector.multi_reduction <add>, %38, %cst_19 [0] : vector<32x128xf32> to vector<128xf32>
    %40 = vector.shape_cast %39 : vector<128xf32> to vector<1x128xf32>
    %c0_20 = arith.constant 0 : index
    %c0_21 = arith.constant 0 : index
    %41 = vector.load %arg9[%c0_20, %c0_21] : memref<1x1xf32, #tpu.memory_space<vmem>>, vector<1x1xf32>
    %42 = vector.broadcast %41 : vector<1x1xf32> to vector<1x128xf32>
    %43 = arith.addf %40, %42 : vector<1x128xf32>
    %cst_22 = arith.constant 0.000000e+00 : f32
    %44 = vector.broadcast %cst_22 : f32 to vector<1x128xf32>
    %45 = arith.subf %44, %43 : vector<1x128xf32>
    %46 = math.exp %45 : vector<1x128xf32>
    %cst_23 = arith.constant 1.000000e+00 : f32
    %47 = vector.broadcast %cst_23 : f32 to vector<1x128xf32>
    %48 = arith.addf %47, %46 : vector<1x128xf32>
    %49 = tpu.reciprocal %48 {approx = true} : vector<1x128xf32> -> vector<1x128xf32>
    %c0_24 = arith.constant 0 : index
    %c0_25 = arith.constant 0 : index
    %50 = vector.load %arg10[%c0_24, %c0_25] : memref<1x128xf32, #tpu.memory_space<vmem>>, vector<1x128xf32>
    tpu.vector_store %arg10[%c0_24, %c0_25], %49 {strides = array<i32>} : memref<1x128xf32, #tpu.memory_space<vmem>>, vector<1x128xf32>,
    return
  }
  func.func @transform_0(%arg0: i32) -> (i32, i32) {
    %c0_i32 = arith.constant 0 : i32
    %c0_i32_0 = arith.constant 0 : i32
    return %c0_i32, %arg0 : i32, i32
  }
  func.func @transform_1(%arg0: i32) -> (i32, i32) {
    %c0_i32 = arith.constant 0 : i32
    %c0_i32_0 = arith.constant 0 : i32
    %c0_i32_1 = arith.constant 0 : i32
    return %c0_i32, %c0_i32_0 : i32, i32
  }
  func.func @transform_2(%arg0: i32) -> (i32, i32) {
    %c0_i32 = arith.constant 0 : i32
    %c0_i32_0 = arith.constant 0 : i32
    %c0_i32_1 = arith.constant 0 : i32
    return %c0_i32, %c0_i32_0 : i32, i32
  }
  func.func @transform_3(%arg0: i32) -> (i32, i32) {
    %c0_i32 = arith.constant 0 : i32
    %c0_i32_0 = arith.constant 0 : i32
    %c0_i32_1 = arith.constant 0 : i32
    return %c0_i32, %c0_i32_0 : i32, i32
  }
  func.func @transform_4(%arg0: i32) -> (i32, i32) {
    %c0_i32 = arith.constant 0 : i32
    %c0_i32_0 = arith.constant 0 : i32
    %c0_i32_1 = arith.constant 0 : i32
    return %c0_i32, %c0_i32_0 : i32, i32
  }
  func.func @transform_5(%arg0: i32) -> (i32, i32) {
    %c0_i32 = arith.constant 0 : i32
    %c0_i32_0 = arith.constant 0 : i32
    %c0_i32_1 = arith.constant 0 : i32
    return %c0_i32, %c0_i32_0 : i32, i32
  }
  func.func @transform_6(%arg0: i32) -> (i32, i32) {
    %c0_i32 = arith.constant 0 : i32
    %c0_i32_0 = arith.constant 0 : i32
    %c0_i32_1 = arith.constant 0 : i32
    return %c0_i32, %c0_i32_0 : i32, i32
  }
  func.func @transform_7(%arg0: i32) -> (i32, i32) {
    %c0_i32 = arith.constant 0 : i32
    %c0_i32_0 = arith.constant 0 : i32
    %c0_i32_1 = arith.constant 0 : i32
    return %c0_i32, %c0_i32_0 : i32, i32
  }
  func.func @transform_8(%arg0: i32) -> (i32, i32) {
    %c0_i32 = arith.constant 0 : i32
    %c0_i32_0 = arith.constant 0 : i32
    %c0_i32_1 = arith.constant 0 : i32
    return %c0_i32, %c0_i32_0 : i32, i32
  }
  func.func @transform_9(%arg0: i32) -> (i32, i32) {
    %c0_i32 = arith.constant 0 : i32
    %c0_i32_0 = arith.constant 0 : i32
    return %c0_i32, %arg0 : i32, i32
  }
}

</mosaic_0001>

<bundles_post_ra>
// kernel: tpu_custom_call.1
= control target key start
LH: loop header
LB: loop body
LE: loop exit
PB: predicated region body
PF: predicated region fallthrough
CT: control target
= control target key end

     0   :  { %s509_s0 = inlined_call_operand.vmem [shape: f32[2,128], index: 0, kind: input, shape index: {}]   ;;  %s510_s1 = inlined_call_operand.vmem [shape: f32[32,2], index: 1, kind: input, shape index: {}]   ;;  %s511_s2 = inlined_call_operand.vmem [shape: f32[32,1], index: 2, kind: input, shape index: {}]   ;;  %s512_s3 = inlined_call_operand.vmem [shape: f32[32,32], index: 3, kind: input, shape index: {}]   ;;  %s513_s4 = inlined_call_operand.vmem [shape: f32[32,1], index: 4, kind: input, shape index: {}]   ;;  %s514_s5 = inlined_call_operand.vmem [shape: f32[32,32], index: 5, kind: input, shape index: {}]   ;;  %s515_s6 = inlined_call_operand.vmem [shape: f32[32,1], index: 6, kind: input, shape index: {}]   ;;  %s516_s7 = inlined_call_operand.vmem [shape: f32[32,1], index: 7, kind: input, shape index: {}]   ;;  %s517_s8 = inlined_call_operand.<no memory space> [shape: f32[1,1], index: 8, kind: input, shape index: {}]   ;;  %s518_s9 = inlined_call_operand.hbm [shape: f32[1,128], index: 9, kind: output, shape index: {}]  }
   0x1   :  { %v14_v0 = vstv %s517_s8 }
   0x2   :  { %15 = vst [vmem:[#allocation2] sm:$0x1] %v14_v0 }
   0x3   :  { %v39_v1 = vld [vmem:[%s510_s1 + $0x10] sm:$0xff]  ;;  %v37_v2 = vld [vmem:[%s510_s1] sm:$0xff]  ;;  %v359_v3 = vmov 1   ;;  %v360_v4 = vmov 0  }
   0x4   :  { %326 = vset.pattern.permute.xlu0 %v359_v3  ;;  %324 = vset.pattern.permute.xlu1 %v359_v3 }
   0x5   :  { %325 = vset.pattern.permute.xlu2 %v360_v4  ;;  %75 = vperm.xlu1 %324, %v39_v1  }
   0x6   :  { %67 = vperm.xlu0 %326, %v37_v2   ;;  %43 = vperm.xlu2 %325, %v37_v2  }
   0x7   :  { %16 = vsyncpa [#allocation4], 0  ;;  %v40_v5 = vld [vmem:[%s510_s1 + $0x18] sm:$0xff]  ;;  %v38_v6 = vld [vmem:[%s510_s1 + $0x8] sm:$0xff]  ;;  %vm155_vm0 = vcmask 261120   ;;  %s304_s18 = sshll.u32 %s518_s9, 4  ;;  %s305_s18 = int_to_ptr.hbm [resolvable:$true] %s304_s18 }
   0x8   :  { %v93_v7 = vld [vmem:[%s511_s2 + $0x10] sm:$0xff]  ;;  %v91_v8 = vld [vmem:[%s511_s2] sm:$0xff]  ;;  %v94_v9 = vld [vmem:[%s511_s2 + $0x18] sm:$0xff] }
   0x9   :  { %v92_v10 = vld [vmem:[%s511_s2 + $0x8] sm:$0xff]  ;;  %v134_v11 = vld [vmem:[%s513_s4 + $0x18] sm:$0xff]  ;;  %v133_v12 = vld [vmem:[%s513_s4 + $0x10] sm:$0xff] }
   0xa   :  { %v193_v13 = vld [vmem:[%s515_s6] sm:$0xff]  ;;  %v132_v14 = vld [vmem:[%s513_s4 + $0x8] sm:$0xff]  ;;  %v196_v16 = vld [vmem:[%s515_s6 + $0x18] sm:$0xff] }
   0xb   :  { %v131_v15 = vld [vmem:[%s513_s4] sm:$0xff]  ;;  %v195_v17 = vld [vmem:[%s515_s6 + $0x10] sm:$0xff]  ;;  %v194_v18 = vld [vmem:[%s515_s6 + $0x8] sm:$0xff] }
   0xc   :  { %v248_v19 = vld [vmem:[%s516_s7 + $0x10] sm:$0xff]  ;;  %v247_v20 = vld [vmem:[%s516_s7 + $0x8] sm:$0xff]  ;;  %v246_v21 = vld [vmem:[%s516_s7] sm:$0xff] }
   0xd   :  { %79 = vperm.xlu1 %324, %v40_v5   ;;  %v283_v22 = vld [vmem:[#allocation2] sm:$0x1]  ;;  %v249_v23 = vld [vmem:[%s516_s7 + $0x18] sm:$0xff]  ;;  %v124_v61 = vld [vmem:[%s512_s3 + $0x8] sm:$0xff] }
   0xe   :  { %327 = vset.pattern.permute.xlu0 %v360_v4  ;;  %48 = vperm.xlu2 %325, %v38_v6   ;;  %v36_v30 = vld [vmem:[%s509_s0] sm:$0x3]  ;;  %v125_v62 = vld [vmem:[%s512_s3 + $0x10] sm:$0xff]  ;;  %v126_v63 = vld [vmem:[%s512_s3 + $0x18] sm:$0xff] }
   0xf   :  { %53 = vperm.xlu0 %327, %v39_v1   ;;  %v61_v31 = vperm.slane %v36_v30, 0  ;;  %v82_v32 = vperm.slane %v36_v30, 1  ;;  %v123_v59 = vld [vmem:[%s512_s3] sm:$0xff]  ;;  %v128_v2 = vpack.c.bf16 %v126_v63, %v125_v62 }
  0x10   :  { %v127_v1 = vpack.c.bf16 %v124_v61, %v123_v59 }
  0x15   :  { %71 = vperm.xlu1 %324, %v38_v6  }
  0x16   :  { %107 = vperm.xlu2 %325, %v93_v7  }
  0x17   :  { %58 = vperm.xlu0 %327, %v40_v5  }
  0x1d   :  { %328 = vset.pattern.permute.xlu1 %v360_v4 }
  0x1e   :  { %97 = vperm.xlu2 %325, %v91_v8   ;;  %112 = vperm.xlu1 %328, %v94_v9  }
  0x1f   :  { %102 = vperm.xlu0 %327, %v92_v10  }
  0x26   :  { %152 = vperm.xlu2 %325, %v134_v11   ;;  %147 = vperm.xlu1 %328, %v133_v12  }
  0x27   :  { %199 = vperm.xlu0 %327, %v193_v13  }
  0x2e   :  { %142 = vperm.xlu2 %325, %v132_v14   ;;  %137 = vperm.xlu1 %328, %v131_v15  }
  0x2f   :  { %214 = vperm.xlu0 %327, %v196_v16  }
  0x36   :  { %209 = vperm.xlu2 %325, %v195_v17   ;;  %204 = vperm.xlu1 %328, %v194_v18  }
  0x37   :  { %262 = vperm.xlu0 %327, %v248_v19   ;;  %v185_v19 = vld [vmem:[%s514_s5] sm:$0xff] }
  0x3e   :  { %257 = vperm.xlu2 %325, %v247_v20   ;;  %252 = vperm.xlu1 %328, %v246_v21   ;;  %v186_v21 = vld [vmem:[%s514_s5 + $0x8] sm:$0xff] }
  0x46   :  { %286 = vperm.xlu2 %325, %v283_v22   ;;  %267 = vperm.xlu1 %328, %v249_v23   ;;  %v187_v22 = vld [vmem:[%s514_s5 + $0x10] sm:$0xff]  ;;  %v188_v23 = vld [vmem:[%s514_s5 + $0x18] sm:$0xff]  ;;  %s361_s5 = smov [#allocation3]  }
  0x47   :  { %s302_s8 = sshll.u32 %s361_s5, 4  ;;  %s303_s8 = int_to_ptr.vmem [resolvable:$true] %s302_s8 }
  0x60   :  { %v44_v24 = vpop.permute.xlu2 %43 }
  0x61   :  { %v62_v38 = vmul.f32 %v61_v31, %v44_v24 }
  0x68   :  { %v49_v27 = vpop.permute.xlu2 %48 }
  0x69   :  { %v63_v44 = vmul.f32 %v61_v31, %v49_v27 }
  0x70   :  { %v108_v35 = vpop.permute.xlu2 %107 }
  0x77   :  { %v76_v25 = vpop.permute.xlu1 %75 }
  0x78   :  { %v68_v26 = vpop.permute.xlu0 %67  ;;  %v85_v36 = vmul.f32 %v82_v32, %v76_v25  ;;  %v98_v52 = vpop.permute.xlu2 %97  ;;  %v189_v25 = vpack.c.bf16 %v186_v21, %v185_v19 }
  0x79   :  { %v83_v39 = vmul.f32 %v82_v32, %v68_v26  ;;  %v190_v26 = vpack.c.bf16 %v188_v23, %v187_v22 }
  0x7b   :  { %v87_v45 = vadd.f32 %v83_v39, %v62_v38 }
  0x7d   :  { %v115_v56 = vadd.f32 %v98_v52, %v87_v45 }
  0x7f   :  { %v80_v28 = vpop.permute.xlu1 %79  ;;  %v119_v60 = vmax.f32 %v115_v56, 0.0 }
  0x80   :  { %v86_v43 = vmul.f32 %v82_v32, %v80_v28  ;;  %v153_v4 = vpop.permute.xlu2 %152 }
  0x81   :  { %v54_v29 = vpop.permute.xlu0 %53 }
  0x82   :  { %v64_v33 = vmul.f32 %v61_v31, %v54_v29 }
  0x84   :  { %v89_v40 = vadd.f32 %v85_v36, %v64_v33 }
  0x86   :  { %v117_v47 = vadd.f32 %v108_v35, %v89_v40 }
  0x87   :  { %v72_v34 = vpop.permute.xlu1 %71 }
  0x88   :  { %v84_v42 = vmul.f32 %v82_v32, %v72_v34  ;;  %v121_v55 = vmax.f32 %v117_v47, 0.0  ;;  %v143_v9 = vpop.permute.xlu2 %142 }
  0x89   :  { %v59_v37 = vpop.permute.xlu0 %58 }
  0x8a   :  { %v65_v41 = vmul.f32 %v61_v31, %v59_v37  ;;  %v88_v49 = vadd.f32 %v84_v42, %v63_v44 }
  0x8c   :  { %v90_v46 = vadd.f32 %v86_v43, %v65_v41 }
  0x90   :  { %v113_v48 = vpop.permute.xlu1 %112  ;;  %v210_v30 = vpop.permute.xlu2 %209 }
  0x91   :  { %v118_v50 = vadd.f32 %v113_v48, %v90_v46  ;;  %v103_v51 = vpop.permute.xlu0 %102 }
  0x92   :  { %v116_v53 = vadd.f32 %v103_v51, %v88_v49 }
  0x93   :  { %v122_v54 = vmax.f32 %v118_v50, 0.0 }
  0x94   :  { %v120_v57 = vmax.f32 %v116_v53, 0.0 }
  0x95   :  { %v130_v58 = vpack.c.bf16 %v122_v54, %v121_v55 }
  0x96   :  { %v129_v0 = vpack.c.bf16 %v120_v57, %v119_v60 }
  0x97   :  { %168 = vmatpush.bf16.msra.mxu0 %v130_v58  ;;  %317 = vmatpush.bf16.msra.mxu2 %v130_v58 }
  0x98   :  { %v148_v5 = vpop.permute.xlu1 %147  ;;  %v258_v40 = vpop.permute.xlu2 %257 }
  0x99   :  { %v200_v27 = vpop.permute.xlu0 %199 }
  0x9b   :  { %169 = vmatpush.bf16.msra.mxu0 %v129_v0  ;;  %318 = vmatpush.bf16.msra.mxu2 %v129_v0 }
  0x9e   :  { %313 = vmatmul.msk.bf16.vlgmr.msra.gmra.mxu0 %vm155_vm0, %v127_v1  ;;  %314 = vmatmul.msk.bf16.vlgmr.msra.gmra.mxu2 %vm155_vm0, %v128_v2 }
  0xa0   :  { %v138_v13 = vpop.permute.xlu1 %137  ;;  %v287_v58 = vpop.permute.xlu2 %286 }
  0xa1   :  { %v215_v32 = vpop.permute.xlu0 %214  ;;  %v289_v60 = vperm.slane %v287_v58, 0 }
  0xa8   :  { %v205_v28 = vpop.permute.xlu1 %204 }
  0xa9   :  { %v263_v47 = vpop.permute.xlu0 %262 }
  0xb0   :  { %v253_v34 = vpop.permute.xlu1 %252 }
  0xb8   :  { %v268_v50 = vpop.permute.xlu1 %267 }
 0x11b   :  { %v171_v3 = vpop.f32.mrf.mxu0 }
 0x11c   :  { %v172_v14 = vadd.f32 %v171_v3, %v138_v13 }
 0x11e   :  { %v181_v20 = vmax.f32 %v172_v14, 0.0 }
 0x121   :  { %v176_v6 = vpop.f32.mrf.mxu2 }
 0x122   :  { %v177_v8 = vadd.f32 %v176_v6, %v148_v5 }
 0x123   :  { %v173_v7 = vpop.f32.mrf.mxu0 }
 0x124   :  { %v174_v11 = vadd.f32 %v173_v7, %v143_v9  ;;  %v183_v15 = vmax.f32 %v177_v8, 0.0 }
 0x126   :  { %v182_v17 = vmax.f32 %v174_v11, 0.0 }
 0x128   :  { %v191_v24 = vpack.c.bf16 %v182_v17, %v181_v20 }
 0x129   :  { %v178_v10 = vpop.f32.mrf.mxu2 }
 0x12a   :  { %v179_v12 = vadd.f32 %v178_v10, %v153_v4 }
 0x12c   :  { %v184_v16 = vmax.f32 %v179_v12, 0.0 }
 0x12e   :  { %v192_v18 = vpack.c.bf16 %v184_v16, %v183_v15 }
 0x130   :  { %229 = vmatpush.bf16.msra.mxu1 %v192_v18  ;;  %319 = vmatpush.bf16.msra.mxu3 %v192_v18 }
 0x134   :  { %230 = vmatpush.bf16.msra.mxu1 %v191_v24  ;;  %320 = vmatpush.bf16.msra.mxu3 %v191_v24 }
 0x137   :  { %315 = vmatmul.msk.bf16.vlgmr.msra.gmra.mxu1 %vm155_vm0, %v189_v25  ;;  %316 = vmatmul.msk.bf16.vlgmr.msra.gmra.mxu3 %vm155_vm0, %v190_v26 }
 0x1b4   :  { %v232_v29 = vpop.f32.mrf.mxu1 }
 0x1b5   :  { %v233_v31 = vadd.f32 %v232_v29, %v200_v27 }
 0x1b7   :  { %v242_v36 = vmax.f32 %v233_v31, 0.0 }
 0x1b9   :  { %v270_v41 = vmul.f32 %v253_v34, %v242_v36 }
 0x1ba   :  { %v237_v33 = vpop.f32.mrf.mxu3 }
 0x1bb   :  { %v238_v37 = vadd.f32 %v237_v33, %v210_v30 }
 0x1bc   :  { %v234_v35 = vpop.f32.mrf.mxu1 }
 0x1bd   :  { %v235_v38 = vadd.f32 %v234_v35, %v205_v28  ;;  %v244_v42 = vmax.f32 %v238_v37, 0.0 }
 0x1bf   :  { %v243_v39 = vmax.f32 %v235_v38, 0.0  ;;  %v272_v48 = vmul.f32 %v263_v47, %v244_v42 }
 0x1c1   :  { %v271_v43 = vmul.f32 %v258_v40, %v243_v39 }
 0x1c2   :  { %v239_v44 = vpop.f32.mrf.mxu3 }
 0x1c3   :  { %v274_v45 = vadd.f32 %v271_v43, %v270_v41  ;;  %v240_v46 = vadd.f32 %v239_v44, %v215_v32 }
 0x1c5   :  { %v245_v49 = vmax.f32 %v240_v46, 0.0  ;;  %v275_v52 = vadd.f32 %v274_v45, %v272_v48 }
 0x1c7   :  { %v273_v51 = vmul.f32 %v268_v50, %v245_v49 }
 0x1c9   :  { %v276_v53 = vadd.f32 %v275_v52, %v273_v51 }
 0x1cb   :  { %v277_v54 = vrot.slane %v276_v53, 4 }
 0x1cd   :  { %v278_v55 = vadd.f32 %v277_v54, %v276_v53 }
 0x1cf   :  { %v279_v56 = vrot.slane %v278_v55, 2 }
 0x1d1   :  { %v280_v57 = vadd.f32 %v279_v56, %v278_v55 }
 0x1d3   :  { %v281_v59 = vrot.slane %v280_v57, 1 }
 0x1d5   :  { %v282_v61 = vadd.f32 %v281_v59, %v280_v57 }
 0x1d7   :  { %v290_v62 = vadd.f32 %v289_v60, %v282_v61 }
 0x1d9   :  { %v291_v63 = vsub.f32 0.0, %v290_v62 }
 0x1db   :  { %v292_v0 = vmul.f32 1.442695, %v291_v63 }
 0x1dd   :  { %329 = vpow2.f32 %v292_v0 }
 0x1e3   :  { %v330_v1 = vpop.eup %329 }
 0x1e4   :  { %v294_v2 = vadd.f32 1.0, %v330_v1 }
 0x1e6   :  { %331 = vrcp.f32 %v294_v2 }
 0x1ec   :  { %v332_v3 = vpop.eup %331 }
 0x1ed   :  { %296 = vst [vmem:[#allocation3] sm:$0x1] %v332_v3 }
 0x1ee   :  { %307 = dma.vmem_to_hbm [thread:$0]  %s303_s8, 16, %s305_s18, [#allocation4]  }
 0x1ef   :  { %357 = dma.done.wait [#allocation4], 16  }
 0x1f0   :  { %358 = vsyncadd [#allocation4], 4294967280 }
 0x1f1   :  { %312 = vsyncpa [#allocation4], 1 }

</bundles_post_ra>
